<compile_context>
chip_gen: v7x
topology: tpu7x:2x2x1
jax: 0.10.0
libtpu: 0.0.40
codegen_flags: <defaults>
</compile_context>

<pallas_src>
import functools
from typing import List, Tuple

import jax
import jax.numpy as jnp
from jax.experimental import pallas as pl
from jax.experimental.pallas import tpu as pltpu


def _round_up(x: int, m: int) -> int:
    return ((x + m - 1) // m) * m


def _film_kernel(input_dim: int, bp: int, hp: int, np_: int,
                 cond_ref, w1_ref, w2_ref, wh_ref, b_ref, out_ref):
    """Fused FiLM-generator forward (single TensorCore, no grid).

    cond_ref: SMEM [Bp] f32      (input_dim == 1)  |  VMEM [Bp, input_dim]
    w1_ref:   VMEM [input_dim, Hp] f32   (zero-padded beyond hidden_dim)
    w2_ref:   VMEM [Hp, Hp]        bf16
    wh_ref:   VMEM [Hp, Np]        bf16  (all gamma/beta heads, packed)
    b_ref:    VMEM [3, W]          f32   row0=b1, row1=b2, row2=head biases
    out_ref:  VMEM [Bp, Np]        f32   packed [g_0|b_0|g_1|b_1|...]
    """
    b1 = b_ref[0:1, :hp]
    b2 = b_ref[1:2, :hp]
    bh = b_ref[2:3, :np_]

    if input_dim == 1:
        # Condition arrives as Bp scalars in SMEM.  Rebuild the [Bp, 1] column
        # with Bp cheap selects (one masked vreg), then do the K=1 matmul as a
        # VPU outer product -- no MXU push/drain, no sub-tile VMEM DMA.
        row_ids = jax.lax.broadcasted_iota(jnp.int32, (bp, 1), 0)
        cond_col = jnp.zeros((bp, 1), jnp.float32)
        for i in range(bp):
            cond_col = jnp.where(row_ids == i, cond_ref[i], cond_col)
        x = cond_col * w1_ref[0:1, :]
    else:
        x = jnp.dot(cond_ref[...], w1_ref[...],
                    preferred_element_type=jnp.float32)
    x = jnp.maximum(x + b1, 0.0)                               # f32 VPU

    x = jnp.dot(x.astype(w2_ref.dtype), w2_ref[...],           # bf16 MXU
                preferred_element_type=jnp.float32)
    x = jnp.maximum(x + b2, 0.0)                               # f32 VPU

    y = jnp.dot(x.astype(wh_ref.dtype), wh_ref[...],           # bf16 MXU
                preferred_element_type=jnp.float32) + bh
    out_ref[...] = y.astype(out_ref.dtype)


def pack_film_params(params, input_dim: int, hidden_dim: int,
                     output_channels: List[int], lane_multiple: int = 128):
    """One-time host-side packing into lane-dense slabs.

    Padded rows/columns of whp and bias row 2 are zero beyond `total`, so the
    packed output columns beyond `total` are exactly zero (invariant relied on
    by consumers that read the slab directly).
    """
    f32 = jnp.float32
    bf16 = jnp.bfloat16
    total = 2 * sum(output_channels)
    hp = _round_up(hidden_dim, lane_multiple)
    np_ = _round_up(total, lane_multiple)
    wmax = max(hp, np_)

    w1p = jnp.zeros((input_dim, hp), f32).at[:, :hidden_dim].set(
        params["w1"].astype(f32))
    w2p = jnp.zeros((hp, hp), bf16).at[:hidden_dim, :hidden_dim].set(
        params["w2"].astype(bf16))

    # Order: gamma_0 | beta_0 | gamma_1 | beta_1 | ...
    head_w = jnp.concatenate(
        [jnp.concatenate([wg, wb], axis=1) for (wg, bg, wb, bb) in params["heads"]],
        axis=1)                               # [hidden_dim, total]
    head_b = jnp.concatenate(
        [jnp.concatenate([bg, bb], axis=1) for (wg, bg, wb, bb) in params["heads"]],
        axis=1)                               # [1, total]
    whp = jnp.zeros((hp, np_), bf16).at[:hidden_dim, :total].set(
        head_w.astype(bf16))

    bias = (jnp.zeros((3, wmax), f32)
            .at[0, :hidden_dim].set(params["b1"][0])
            .at[1, :hidden_dim].set(params["b2"][0])
            .at[2, :total].set(head_b[0]))

    return {"w1p": w1p, "w2p": w2p, "whp": whp, "bias": bias,
            "hp": hp, "np": np_, "total": total}


def film_offsets(output_channels: List[int]) -> List[Tuple[int, int, int]]:
    """Static (gamma_off, beta_off, channels) offsets into the packed slab."""
    offs, off = [], 0
    for c in output_channels:
        offs.append((off, off + c, c))
        off += 2 * c
    return offs


def make_film_forward(input_dim: int, hidden_dim: int,
                      output_channels: List[int], packed, batch_size: int):
    """Returns a jitted forward: condition [B, input_dim] -> packed [Bp, Np] slab."""
    hp, np_ = packed["hp"], packed["np"]
    bp = _round_up(max(batch_size, 1), 8)     # sublane-aligned batch

    kernel = functools.partial(_film_kernel, input_dim, bp, hp, np_)
    vmem = pl.BlockSpec(memory_space=pltpu.MemorySpace.VMEM)
    smem = pl.BlockSpec(memory_space=pltpu.MemorySpace.SMEM)
    cond_spec = smem if input_dim == 1 else vmem

    flops = 2 * bp * (input_dim * hp + hp * hp + hp * np_)
    bytes_accessed = (bp * max(input_dim, 1) * 4
                      + packed["w1p"].size * 4
                      + packed["w2p"].size * 2
                      + packed["whp"].size * 2
                      + packed["bias"].size * 4
                      + bp * np_ * 4)
    call = pl.pallas_call(
        kernel,
        out_shape=jax.ShapeDtypeStruct((bp, np_), jnp.float32),
        in_specs=[cond_spec, vmem, vmem, vmem, vmem],
        out_specs=vmem,
        cost_estimate=pl.CostEstimate(flops=flops, transcendentals=0,
                                      bytes_accessed=bytes_accessed),
    )

    @jax.jit
    def _forward(condition, w1p, w2p, whp, bias):
        if input_dim == 1:
            cond_arg = jnp.zeros((bp,), jnp.float32).at[:batch_size].set(
                condition[:, 0].astype(jnp.float32))
        else:
            cond_arg = jnp.zeros((bp, input_dim), jnp.float32).at[
                :batch_size, :].set(condition.astype(jnp.float32))
        return call(cond_arg, w1p, w2p, whp, bias)

    def forward(condition):
        return _forward(condition, packed["w1p"], packed["w2p"],
                        packed["whp"], packed["bias"])

    return forward


def unpack_film(slab, batch_size: int, output_channels: List[int]
                ) -> List[Tuple[jax.Array, jax.Array]]:
    """Slice the packed slab back into per-level (gamma, beta).

    NOTE: verification / API-compat only.  Hot-path consumers should index the
    lane-dense slab directly via film_offsets() inside their own jit.
    """
    out = []
    for g_off, b_off, c in film_offsets(output_channels):
        out.append((slab[:batch_size, g_off:g_off + c],
                    slab[:batch_size, b_off:b_off + c]))
    return out


def init_params(key, input_dim: int, hidden_dim: int, output_channels: List[int]):
    """Deterministic synthetic parameter init (mimics nn.Linear shapes).

    Weights stored [in_features, out_features]; biases [1, out_features].
    """
    def linear(k, fan_in, fan_out):
        kw, kb = jax.random.split(k)
        bound = 1.0 / jnp.sqrt(jnp.float32(fan_in))
        w = jax.random.uniform(kw, (fan_in, fan_out), jnp.float32, -bound, bound)
        b = jax.random.uniform(kb, (1, fan_out), jnp.float32, -bound, bound)
        return w, b

    keys = jax.random.split(key, 2 + 2 * len(output_channels))
    w1, b1 = linear(keys[0], input_dim, hidden_dim)
    w2, b2 = linear(keys[1], hidden_dim, hidden_dim)
    heads = []
    for i, c in enumerate(output_channels):
        wg, bg = linear(keys[2 + 2 * i], hidden_dim, c)
        wb, bb = linear(keys[3 + 2 * i], hidden_dim, c)
        heads.append((wg, bg, wb, bb))
    return {"w1": w1, "b1": b1, "w2": w2, "b2": b2, "heads": heads}


def reference_forward(condition, params, weight_dtype=jnp.float32):
    """Pure-JAX reference. weight_dtype=bf16 mirrors the kernel's MXU casts."""
    x = jnp.maximum(condition @ params["w1"] + params["b1"], 0.0)
    x = jnp.maximum(
        jnp.dot(x.astype(weight_dtype), params["w2"].astype(weight_dtype),
                preferred_element_type=jnp.float32) + params["b2"], 0.0)
    out = []
    for (wg, bg, wb, bb) in params["heads"]:
        g = jnp.dot(x.astype(weight_dtype), wg.astype(weight_dtype),
                    preferred_element_type=jnp.float32) + bg
        b = jnp.dot(x.astype(weight_dtype), wb.astype(weight_dtype),
                    preferred_element_type=jnp.float32) + bb
        out.append((g, b))
    return out


if __name__ == "__main__":
    B = 2
    INPUT_DIM = 1
    HIDDEN_DIM = 32
    OUTPUT_CHANNELS = [4, 8, 16]

    key = jax.random.PRNGKey(0)
    k_cond, k_params = jax.random.split(key)

    condition = jax.random.uniform(k_cond, (B, INPUT_DIM), jnp.float32)
    params = init_params(k_params, INPUT_DIM, HIDDEN_DIM, OUTPUT_CHANNELS)

    # One-time host-side packing of weights/biases into lane-dense slabs.
    packed = pack_film_params(params, INPUT_DIM, HIDDEN_DIM, OUTPUT_CHANNELS)
    forward = make_film_forward(INPUT_DIM, HIDDEN_DIM, OUTPUT_CHANNELS,
                                packed, B)

    slab = forward(condition)                 # packed [Bp, Np] lane-dense slab
    jax.block_until_ready(slab)

    # --- verification only (not the hot path) ---
    film = unpack_film(slab, B, OUTPUT_CHANNELS)

    # Tight check vs a reference that mirrors the bf16 MXU-operand casts.
    ref_bf16 = reference_forward(condition, params, weight_dtype=jnp.bfloat16)
    for (g, bta), (gr, br) in zip(film, ref_bf16):
        assert g.shape == gr.shape and bta.shape == br.shape
        assert jnp.allclose(g, gr, atol=1e-4, rtol=1e-4)
        assert jnp.allclose(bta, br, atol=1e-4, rtol=1e-4)

    # Loose check vs the pure-f32 module semantics (bf16 weight rounding only).
    ref_f32 = reference_forward(condition, params, weight_dtype=jnp.float32)
    for (g, bta), (gr, br) in zip(film, ref_f32):
        assert jnp.allclose(g, gr, atol=2e-2, rtol=2e-2)
        assert jnp.allclose(bta, br, atol=2e-2, rtol=2e-2)

    print("KERNEL_OK")
</pallas_src>

<mosaic_0001>
module attributes {stable_mosaic.version = 11 : i64} {
  func.func @_film_kernel(%arg0: memref<8xf32, #tpu.memory_space<smem>>, %arg1: memref<1x128xf32, #tpu.memory_space<vmem>>, %arg2: memref<128x128xbf16, #tpu.memory_space<vmem>>, %arg3: memref<128x128xbf16, #tpu.memory_space<vmem>>, %arg4: memref<3x128xf32, #tpu.memory_space<vmem>>, %arg5: memref<8x128xf32, #tpu.memory_space<vmem>>) attributes {dimension_semantics = [], scalar_prefetch = 0 : i64, scratch_operands = 0 : i64, tpu.core_type = #tpu.core_type<tc>} {
    %c0 = arith.constant 0 : index
    %c0_0 = arith.constant 0 : index
    %0 = vector.load %arg4[%c0, %c0_0] : memref<3x128xf32, #tpu.memory_space<vmem>>, vector<1x128xf32>
    %c1 = arith.constant 1 : index
    %c0_1 = arith.constant 0 : index
    %1 = vector.load %arg4[%c1, %c0_1] : memref<3x128xf32, #tpu.memory_space<vmem>>, vector<1x128xf32>
    %c2 = arith.constant 2 : index
    %c0_2 = arith.constant 0 : index
    %2 = vector.load %arg4[%c2, %c0_2] : memref<3x128xf32, #tpu.memory_space<vmem>>, vector<1x128xf32>
    %3 = tpu.iota {dimensions = array<i32: 0>} : vector<8x1xi32>
    %cst = arith.constant 0.000000e+00 : f32
    %4 = vector.broadcast %cst : f32 to vector<8x1xf32>
    %c0_i32 = arith.constant 0 : i32
    %5 = vector.broadcast %c0_i32 : i32 to vector<8x1xi32>
    %6 = arith.cmpi eq, %3, %5 : vector<8x1xi32>
    %c0_3 = arith.constant 0 : index
    %7 = memref.load %arg0[%c0_3] : memref<8xf32, #tpu.memory_space<smem>>
    %8 = vector.broadcast %7 : f32 to vector<8x1xf32>
    %9 = arith.select %6, %8, %4 : vector<8x1xi1>, vector<8x1xf32>
    %c1_i32 = arith.constant 1 : i32
    %10 = vector.broadcast %c1_i32 : i32 to vector<8x1xi32>
    %11 = arith.cmpi eq, %3, %10 : vector<8x1xi32>
    %c1_4 = arith.constant 1 : index
    %12 = memref.load %arg0[%c1_4] : memref<8xf32, #tpu.memory_space<smem>>
    %13 = vector.broadcast %12 : f32 to vector<8x1xf32>
    %14 = arith.select %11, %13, %9 : vector<8x1xi1>, vector<8x1xf32>
    %c2_i32 = arith.constant 2 : i32
    %15 = vector.broadcast %c2_i32 : i32 to vector<8x1xi32>
    %16 = arith.cmpi eq, %3, %15 : vector<8x1xi32>
    %c2_5 = arith.constant 2 : index
    %17 = memref.load %arg0[%c2_5] : memref<8xf32, #tpu.memory_space<smem>>
    %18 = vector.broadcast %17 : f32 to vector<8x1xf32>
    %19 = arith.select %16, %18, %14 : vector<8x1xi1>, vector<8x1xf32>
    %c3_i32 = arith.constant 3 : i32
    %20 = vector.broadcast %c3_i32 : i32 to vector<8x1xi32>
    %21 = arith.cmpi eq, %3, %20 : vector<8x1xi32>
    %c3 = arith.constant 3 : index
    %22 = memref.load %arg0[%c3] : memref<8xf32, #tpu.memory_space<smem>>
    %23 = vector.broadcast %22 : f32 to vector<8x1xf32>
    %24 = arith.select %21, %23, %19 : vector<8x1xi1>, vector<8x1xf32>
    %c4_i32 = arith.constant 4 : i32
    %25 = vector.broadcast %c4_i32 : i32 to vector<8x1xi32>
    %26 = arith.cmpi eq, %3, %25 : vector<8x1xi32>
    %c4 = arith.constant 4 : index
    %27 = memref.load %arg0[%c4] : memref<8xf32, #tpu.memory_space<smem>>
    %28 = vector.broadcast %27 : f32 to vector<8x1xf32>
    %29 = arith.select %26, %28, %24 : vector<8x1xi1>, vector<8x1xf32>
    %c5_i32 = arith.constant 5 : i32
    %30 = vector.broadcast %c5_i32 : i32 to vector<8x1xi32>
    %31 = arith.cmpi eq, %3, %30 : vector<8x1xi32>
    %c5 = arith.constant 5 : index
    %32 = memref.load %arg0[%c5] : memref<8xf32, #tpu.memory_space<smem>>
    %33 = vector.broadcast %32 : f32 to vector<8x1xf32>
    %34 = arith.select %31, %33, %29 : vector<8x1xi1>, vector<8x1xf32>
    %c6_i32 = arith.constant 6 : i32
    %35 = vector.broadcast %c6_i32 : i32 to vector<8x1xi32>
    %36 = arith.cmpi eq, %3, %35 : vector<8x1xi32>
    %c6 = arith.constant 6 : index
    %37 = memref.load %arg0[%c6] : memref<8xf32, #tpu.memory_space<smem>>
    %38 = vector.broadcast %37 : f32 to vector<8x1xf32>
    %39 = arith.select %36, %38, %34 : vector<8x1xi1>, vector<8x1xf32>
    %c7_i32 = arith.constant 7 : i32
    %40 = vector.broadcast %c7_i32 : i32 to vector<8x1xi32>
    %41 = arith.cmpi eq, %3, %40 : vector<8x1xi32>
    %c7 = arith.constant 7 : index
    %42 = memref.load %arg0[%c7] : memref<8xf32, #tpu.memory_space<smem>>
    %43 = vector.broadcast %42 : f32 to vector<8x1xf32>
    %44 = arith.select %41, %43, %39 : vector<8x1xi1>, vector<8x1xf32>
    %c0_6 = arith.constant 0 : index
    %c0_7 = arith.constant 0 : index
    %45 = vector.load %arg1[%c0_6, %c0_7] : memref<1x128xf32, #tpu.memory_space<vmem>>, vector<1x128xf32>
    %46 = vector.broadcast %44 : vector<8x1xf32> to vector<8x128xf32>
    %47 = vector.broadcast %45 : vector<1x128xf32> to vector<8x128xf32>
    %48 = arith.mulf %46, %47 : vector<8x128xf32>
    %49 = vector.broadcast %0 : vector<1x128xf32> to vector<8x128xf32>
    %50 = arith.addf %48, %49 : vector<8x128xf32>
    %cst_8 = arith.constant 0.000000e+00 : f32
    %51 = vector.broadcast %cst_8 : f32 to vector<8x128xf32>
    %52 = arith.maximumf %50, %51 : vector<8x128xf32>
    %53 = arith.truncf %52 : vector<8x128xf32> to vector<8x128xbf16>
    %c0_9 = arith.constant 0 : index
    %c0_10 = arith.constant 0 : index
    %54 = vector.load %arg2[%c0_9, %c0_10] : memref<128x128xbf16, #tpu.memory_space<vmem>>, vector<128x128xbf16>
    %cst_11 = arith.constant dense<0.000000e+00> : vector<8x128xf32>
    %55 = tpu.matmul %53, %54, %cst_11 {dimension_numbers = #tpu.dot_dimension_numbers<[1], [0], [0], [1], [0, 0, 1, 1], [], []>} : vector<8x128xbf16>, vector<128x128xbf16>, vector<8x128xf32> -> vector<8x128xf32>
    %56 = vector.broadcast %1 : vector<1x128xf32> to vector<8x128xf32>
    %57 = arith.addf %55, %56 : vector<8x128xf32>
    %cst_12 = arith.constant 0.000000e+00 : f32
    %58 = vector.broadcast %cst_12 : f32 to vector<8x128xf32>
    %59 = arith.maximumf %57, %58 : vector<8x128xf32>
    %60 = arith.truncf %59 : vector<8x128xf32> to vector<8x128xbf16>
    %c0_13 = arith.constant 0 : index
    %c0_14 = arith.constant 0 : index
    %61 = vector.load %arg3[%c0_13, %c0_14] : memref<128x128xbf16, #tpu.memory_space<vmem>>, vector<128x128xbf16>
    %cst_15 = arith.constant dense<0.000000e+00> : vector<8x128xf32>
    %62 = tpu.matmul %60, %61, %cst_15 {dimension_numbers = #tpu.dot_dimension_numbers<[1], [0], [0], [1], [0, 0, 1, 1], [], []>} : vector<8x128xbf16>, vector<128x128xbf16>, vector<8x128xf32> -> vector<8x128xf32>
    %63 = vector.broadcast %2 : vector<1x128xf32> to vector<8x128xf32>
    %64 = arith.addf %62, %63 : vector<8x128xf32>
    %c0_16 = arith.constant 0 : index
    %c0_17 = arith.constant 0 : index
    %65 = vector.load %arg5[%c0_16, %c0_17] : memref<8x128xf32, #tpu.memory_space<vmem>>, vector<8x128xf32>
    tpu.vector_store %arg5[%c0_16, %c0_17], %64 {strides = array<i32>} : memref<8x128xf32, #tpu.memory_space<vmem>>, vector<8x128xf32>,
    return
  }
}

</mosaic_0001>

<bundles_post_ra>
// kernel: _forward.1
= control target key start
LH: loop header
LB: loop body
LE: loop exit
PB: predicated region body
PF: predicated region fallthrough
CT: control target
= control target key end

     0   :  { %10 = vsyncpa [#allocation5], 0  ;;  %s668_s0 = inlined_call_operand.vmem [shape: f32[8], index: 0, kind: input, shape index: {}]   ;;  %s669_s1 = inlined_call_operand.vmem [shape: f32[1,128], index: 1, kind: input, shape index: {}]   ;;  %s670_s2 = inlined_call_operand.hbm [shape: bf16[128,128], index: 2, kind: input, shape index: {}]   ;;  %s671_s3 = inlined_call_operand.hbm [shape: bf16[128,128], index: 3, kind: input, shape index: {}]   ;;  %s672_s4 = inlined_call_operand.vmem [shape: f32[3,128], index: 4, kind: input, shape index: {}]   ;;  %s673_s5 = inlined_call_operand.hbm [shape: f32[8,128], index: 5, kind: output, shape index: {}]  }
   0x1   :  { %11 = vsyncpa [#allocation3], 0 }
   0x2   :  { %12 = vsyncpa [#allocation8], 0 }
   0x3   :  { %13 = vsyncpa [#allocation4], 0  ;;  %s20_s20 = sshll.u32 %s668_s0, 4  ;;  %s21_s20 = int_to_ptr.vmem [resolvable:$true] %s20_s20 }
   0x4   :  { %s460_s21 = scalar_lea.vmem %s21_s20, 16  ;;  %p465_p1 = scmp.lt.s32.totalorder %s21_s20, %s21_s20 }
   0x5   :  { %p461_p0 = scmp.ne.s32.totalorder %s21_s20, %s460_s21  ;;  %p466_p2 = scmp.lt.s32.totalorder %s460_s21, %s460_s21 }
   0x7   :  { %p467_p3 = por %p466_p2, %p465_p1 }
   0x9   :  { %p468_p4 = pnand %p467_p3, %p461_p0 }
   0xb   :  { %471 = shalt.err (!%p468_p4)
}
   0xc   :  { %s546_s22 = smov [#allocation2]   ;;  %s547_s23 = smov [#allocation6]  }
   0xd   :  { %23 = dma.vmem_to_smem %s21_s20, 16, %s546_s22, [#allocation5]  }
   0xe   :  { %s31_s24 = sshll.u32 %s547_s23, 4  ;;  %s472_s27 = scalar_lea.hbm %s670_s2, 1024  ;;  %s32_s24 = int_to_ptr.vmem [resolvable:$true] %s31_s24 }
   0xf   :  { %p473_p5 = scmp.ne.s32.totalorder %s670_s2, %s472_s27  ;;  %p476_p6 = scmp.lt.u32.totalorder %s472_s27, %s670_s2 }
  0x11   :  { %p478_p7 = pnand %p476_p6, %p473_p5 }
  0x13   :  { %481 = shalt.err (!%p478_p7)
}
  0x14   :  { %s482_s6 = scalar_lea.vmem %s32_s24, 1024  ;;  %p487_p9 = scmp.lt.s32.totalorder %s32_s24, %s32_s24 }
  0x15   :  { %p483_p8 = scmp.ne.s32.totalorder %s32_s24, %s482_s6  ;;  %p488_p10 = scmp.lt.s32.totalorder %s482_s6, %s482_s6 }
  0x17   :  { %p489_p11 = por %p488_p10, %p487_p9 }
  0x19   :  { %p490_p12 = pnand %p489_p11, %p483_p8 }
  0x1b   :  { %493 = shalt.err (!%p490_p12)
}
  0x1c   :  { %s548_s7 = smov 64   ;;  %s549_s8 = smov 4  }
  0x1d   :  { %37 = dma.hbm_to_vmem [thread:$0]  %s670_s2, 1024, %s32_s24, [#allocation3], %s548_s7, %s548_s7, %s549_s8  }
  0x1e   :  { %s550_s11 = smov [#allocation7]   ;;  %s494_s15 = scalar_lea.hbm %s671_s3, 1024 }
  0x1f   :  { %s43_s12 = sshll.u32 %s550_s11, 4  ;;  %p495_p13 = scmp.ne.s32.totalorder %s671_s3, %s494_s15  ;;  %s44_s12 = int_to_ptr.vmem [resolvable:$true] %s43_s12 }
  0x20   :  { %p498_p0 = scmp.lt.u32.totalorder %s494_s15, %s671_s3 }
  0x22   :  { %p500_p1 = pnand %p498_p0, %p495_p13 }
  0x24   :  { %503 = shalt.err (!%p500_p1)
}
  0x25   :  { %s504_s20 = scalar_lea.vmem %s44_s12, 1024  ;;  %p509_p3 = scmp.lt.s32.totalorder %s44_s12, %s44_s12 }
  0x26   :  { %p505_p2 = scmp.ne.s32.totalorder %s44_s12, %s504_s20  ;;  %p510_p4 = scmp.lt.s32.totalorder %s504_s20, %s504_s20 }
  0x28   :  { %p511_p5 = por %p510_p4, %p509_p3 }
  0x2a   :  { %p512_p6 = pnand %p511_p5, %p505_p2 }
  0x2c   :  { %515 = shalt.err (!%p512_p6)
}
  0x2d   :  { %49 = dma.hbm_to_vmem [thread:$0]  %s671_s3, 1024, %s44_s12, [#allocation8], %s548_s7, %s548_s7, %s549_s8  }
  0x2e   :  { %538 = dma.done.wait [#allocation5], 16  }
  0x2f   :  { %539 = vsyncadd [#allocation5], 4294967280 }
  0x30   :  { %540 = dma.done.wait [#allocation3], 1024  }
  0x31   :  { %541 = vsyncadd [#allocation3], 4294966272 }
  0x32   :  { %542 = dma.done.wait [#allocation8], 1024  }
  0x33   :  { %543 = vsyncadd [#allocation8], 4294966272 }
  0x34   :  { %61 = sfence }
  0x35   :  { %v444_v0 = vld [vmem:[#allocation6] sm:$0xff]   ;;  %v551_v1 = vmov 0.0   ;;  %v445_v2 = vld [vmem:[#allocation6 + $0x8] sm:$0xff]   ;;  %vm552_vm0 = vmmov 0   ;;  %v66_v3 = vlaneseq  ;;  %v446_v4 = vld [vmem:[#allocation6 + $0x10] sm:$0xff]   ;;  %s69_s3 = sld [smem:[#allocation2]] }
  0x36   :  { %396 = vmatprep.subr.bf16.mxu0 %v551_v1  ;;  %416 = vmatprep.subr.bf16.mxu1 %v551_v1  ;;  %s351_s22 = sld [smem:[#allocation2 + $0x1]]  ;;  %s352_s23 = sld [smem:[#allocation2 + $0x2]]  ;;  %v447_v6 = vld [vmem:[#allocation6 + $0x18] sm:$0xff]   ;;  %v452_v7 = vld [vmem:[#allocation7] sm:$0xff]   ;;  %v453_v11 = vld [vmem:[#allocation7 + $0x8] sm:$0xff]  }
  0x37   :  { %397 = vmatpush3.bf16.msra.mxu0 %v444_v0  ;;  %412 = vmatprep.mubr.msk.bf16.mxu0 %vm552_vm0, %v551_v1  ;;  %v67_v5 = vshrl.u32 %v66_v3, 7  ;;  %s617_s24 = sld [smem:[#allocation2 + $0x3]]  ;;  %s619_s25 = sld [smem:[#allocation2 + $0x4]]  ;;  %v448_v8 = vld [vmem:[#allocation6 + $0x20] sm:$0xff]   ;;  %v449_v17 = vld [vmem:[#allocation6 + $0x28] sm:$0xff]   ;;  %v454_v22 = vld [vmem:[#allocation7 + $0x10] sm:$0xff]  }
  0x38   :  { %398 = vmatprep.subr.bf16.mxu0 %v551_v1  ;;  %432 = vmatprep.mubr.msk.bf16.mxu1 %vm552_vm0, %v551_v1  ;;  %s621_s26 = sld [smem:[#allocation2 + $0x5]]  ;;  %s624_s27 = sld [smem:[#allocation2 + $0x6]]  ;;  %v358_v26 = vld [vmem:[%s669_s1] ss:$0 sm:$0xff]  ;;  %v450_v28 = vld [vmem:[#allocation6 + $0x30] sm:$0xff]   ;;  %v455_v31 = vld [vmem:[#allocation7 + $0x18] sm:$0xff]  }
  0x39   :  { %s626_s28 = sld [smem:[#allocation2 + $0x7]]  ;;  %vm68_vm1 = vcmp.eq.s32.totalorder %v67_v5, 0  ;;  %vm72_vm2 = vcmp.eq.s32.totalorder %v67_v5, 1  ;;  %vm76_vm3 = vcmp.eq.s32.totalorder %v67_v5, 2  ;;  %417 = vmatpush3.bf16.msra.mxu1 %v452_v7  ;;  %vm80_vm4 = vcmp.eq.s32.totalorder %v67_v5, 3  ;;  %v451_v34 = vld [vmem:[#allocation6 + $0x38] sm:$0xff]  }
  0x3a   :  { %418 = vmatprep.subr.bf16.mxu1 %v551_v1  ;;  %vm84_vm5 = vcmp.eq.s32.totalorder %v67_v5, 4  ;;  %vm88_vm6 = vcmp.eq.s32.totalorder %v67_v5, 5  ;;  %vm92_vm7 = vcmp.eq.s32.totalorder %v67_v5, 6  ;;  %vm96_vm8 = vcmp.eq.s32.totalorder %v67_v5, 7  ;;  %v359_v29 = vld [vmem:[%s672_s4] ss:$0 sm:$0xff] }
  0x3b   :  { %399 = vmatpush3.bf16.msra.mxu0 %v445_v2  ;;  %v70_v9 = vstv %s69_s3  ;;  %v456_v35 = vld [vmem:[#allocation7 + $0x20] sm:$0xff]   ;;  %v457_v38 = vld [vmem:[#allocation7 + $0x28] sm:$0xff]   ;;  %v458_v39 = vld [vmem:[#allocation7 + $0x30] sm:$0xff]   ;;  %s553_s10 = smov [#allocation9]  }
  0x3c   :  { %400 = vmatprep.subr.bf16.mxu0 %v551_v1  ;;  %v74_v10 = vstv %s351_s22  ;;  %v71_v12 = vsel %vm68_vm1, %v70_v9, 0.0  ;;  %v78_v13 = vstv %s352_s23  ;;  %v459_v40 = vld [vmem:[#allocation7 + $0x38] sm:$0xff]   ;;  %v360_v41 = vld [vmem:[%s672_s4 + $0x1] ss:$0 sm:$0xff]  ;;  %v369_v49 = vld [vmem:[%s672_s4 + $0x2] ss:$0 sm:$0xff] }
  0x3d   :  { %v82_v14 = vstv %s617_s24  ;;  %v75_v15 = vsel %vm72_vm2, %v74_v10, %v71_v12  ;;  %v86_v16 = vstv %s619_s25  ;;  %419 = vmatpush3.bf16.msra.mxu1 %v453_v11  ;;  %s340_s11 = sshll.u32 %s553_s10, 4  ;;  %s341_s11 = int_to_ptr.vmem [resolvable:$true] %s340_s11 }
  0x3e   :  { %v79_v18 = vsel %vm76_vm3, %v78_v13, %v75_v15  ;;  %v90_v19 = vstv %s621_s26  ;;  %v94_v21 = vstv %s624_s27  ;;  %420 = vmatprep.subr.bf16.mxu1 %v551_v1  ;;  %s516_s12 = scalar_lea.vmem %s341_s11, 128  ;;  %p521_p8 = scmp.lt.s32.totalorder %s341_s11, %s341_s11 }
  0x3f   :  { %401 = vmatpush3.bf16.msra.mxu0 %v446_v4  ;;  %v83_v20 = vsel %vm80_vm4, %v82_v14, %v79_v18  ;;  %v98_v24 = vstv %s626_s28  ;;  %p517_p7 = scmp.ne.s32.totalorder %s341_s11, %s516_s12  ;;  %p522_p9 = scmp.lt.s32.totalorder %s516_s12, %s516_s12 }
  0x40   :  { %402 = vmatprep.subr.bf16.mxu0 %v551_v1  ;;  %v87_v23 = vsel %vm84_vm5, %v86_v16, %v83_v20 }
  0x41   :  { %v91_v25 = vsel %vm88_vm6, %v90_v19, %v87_v23  ;;  %421 = vmatpush3.bf16.msra.mxu1 %v454_v22  ;;  %p523_p10 = por %p522_p9, %p521_p8 }
  0x42   :  { %v95_v27 = vsel %vm92_vm7, %v94_v21, %v91_v25  ;;  %422 = vmatprep.subr.bf16.mxu1 %v551_v1 }
  0x43   :  { %403 = vmatpush3.bf16.msra.mxu0 %v447_v6  ;;  %v99_v30 = vsel %vm96_vm8, %v98_v24, %v95_v27  ;;  %p524_p11 = pnand %p523_p10, %p517_p7 }
  0x44   :  { %404 = vmatprep.subr.bf16.mxu0 %v551_v1  ;;  %v107_v32 = vmul.f32 %v358_v26, %v99_v30 }
  0x45   :  { %423 = vmatpush3.bf16.msra.mxu1 %v455_v31 }
  0x46   :  { %v112_v33 = vadd.f32 %v359_v29, %v107_v32  ;;  %424 = vmatprep.subr.bf16.mxu1 %v551_v1 }
  0x47   :  { %405 = vmatpush3.bf16.msra.mxu0 %v448_v8 }
  0x48   :  { %406 = vmatprep.subr.bf16.mxu0 %v551_v1  ;;  %v113_v36 = vmax.f32 %v112_v33, 0.0 }
  0x49   :  { %425 = vmatpush3.bf16.msra.mxu1 %v456_v35 }
  0x4a   :  { %v114_v37 = vpack.c.bf16 %v113_v36, %v113_v36  ;;  %426 = vmatprep.subr.bf16.mxu1 %v551_v1 }
  0x4b   :  { %407 = vmatpush3.bf16.msra.mxu0 %v449_v17 }
  0x4c   :  { %408 = vmatprep.subr.bf16.mxu0 %v551_v1 }
  0x4d   :  { %427 = vmatpush3.bf16.msra.mxu1 %v457_v38 }
  0x4e   :  { %428 = vmatprep.subr.bf16.mxu1 %v551_v1 }
  0x4f   :  { %409 = vmatpush3.bf16.msra.mxu0 %v450_v28 }
  0x50   :  { %410 = vmatprep.subr.bf16.mxu0 %v551_v1 }
  0x51   :  { %429 = vmatpush3.bf16.msra.mxu1 %v458_v39 }
  0x52   :  { %430 = vmatprep.subr.bf16.mxu1 %v551_v1 }
  0x53   :  { %411 = vmatpush3.bf16.msra.mxu0 %v451_v34 }
  0x55   :  { %431 = vmatpush3.bf16.msra.mxu1 %v459_v40 }
  0x56   :  { %413 = vmatmul.mubr.bf16.vlgmr.msra.gmra.mrb[0].mxu0 %v114_v37 }
 0x129   :  { %v217_v42 = vpop.f32.mrb[0].mxu0 }
 0x12a   :  { %v218_v43 = vadd.f32 %v360_v41, %v217_v42  ;;  %v414_v44 = vpop.f32.mrb[1].mxu0 }
 0x12b   :  { %v220_v45 = vpop.f32.mrb[2].mxu0 }
 0x12c   :  { %v223_v46 = vmax.f32 %v218_v43, 0.0  ;;  %v415_v47 = vpop.f32.mrb[3].mxu0 }
 0x12e   :  { %v224_v48 = vpack.c.bf16 %v223_v46, %v223_v46 }
 0x130   :  { %433 = vmatmul.mubr.bf16.vlgmr.msra.gmra.mrb[0].mxu1 %v224_v48 }
 0x203   :  { %v327_v50 = vpop.f32.mrb[0].mxu1 }
 0x204   :  { %v328_v51 = vadd.f32 %v369_v49, %v327_v50  ;;  %v434_v52 = vpop.f32.mrb[1].mxu1 }
 0x205   :  { %v330_v53 = vpop.f32.mrb[2].mxu1 }
 0x206   :  { %333 = vst [vmem:[#allocation9] sm:$0xff] %v328_v51  ;;  %v435_v54 = vpop.f32.mrb[3].mxu1 }
 0x207   :  { %527 = shalt.err (!%p524_p11)
}
 0x208   :  { %s528_s4 = scalar_lea.hbm %s673_s5, 128 }
 0x209   :  { %p529_p12 = scmp.ne.s32.totalorder %s673_s5, %s528_s4  ;;  %p532_p13 = scmp.lt.u32.totalorder %s528_s4, %s673_s5 }
 0x20b   :  { %p534_p0 = pnand %p532_p13, %p529_p12 }
 0x20d   :  { %537 = shalt.err (!%p534_p0)
}
 0x20e   :  { %343 = dma.vmem_to_hbm [thread:$0]  %s341_s11, 128, %s673_s5, [#allocation4]  }
 0x20f   :  { %544 = dma.done.wait [#allocation4], 128  }
 0x210   :  { %545 = vsyncadd [#allocation4], 4294967168 }
 0x211   :  { %347 = vsyncpa [#allocation3], 1 }
 0x212   :  { %348 = vsyncpa [#allocation8], 1 }
 0x213   :  { %349 = vsyncpa [#allocation4], 1 }
 0x214   :  { %350 = vsyncpa [#allocation5], 1 }

</bundles_post_ra>
